<compile_context>
chip_gen: v5e
topology: v5e:2x2
jax: 0.10.0
libtpu: 0.0.40
codegen_flags: <defaults>
</compile_context>

<pallas_src>
import math
import functools

import jax
import jax.numpy as jnp
from jax.experimental import pallas as pl
from jax.experimental.pallas import tpu as pltpu


def _round_up(x, m):
    return ((x + m - 1) // m) * m


def _pick_tb(batch, cap=8):
    """Largest divisor of `batch` that is <= cap (batch elements per grid step)."""
    tb = 1
    for d in range(1, min(batch, cap) + 1):
        if batch % d == 0:
            tb = d
    return tb


def _self_attention_kernel(x_ref, w_ref, o_ref, *, norm_fact, dk_pad, tb, n):
    x = x_ref[...]                           # (tb, n, dim_q), native dtype
    w = w_ref[...]                           # (dim_q, 2*dk_pad + dv_pad), native dtype
    dim_q = x.shape[-1]

    # One fused projection matmul; batch folded into the sublane dimension.
    # f32 accumulation on the MXU regardless of input dtype.
    qkv = jnp.dot(x.reshape(tb * n, dim_q), w,
                  preferred_element_type=jnp.float32)      # (tb*n, fused) f32
    qkv = qkv.reshape(tb, n, -1)

    # Lane-tile-aligned slices (each section starts at a multiple of 128 lanes).
    q = qkv[:, :, :dk_pad]                                  # (tb, n, dk_pad)
    k = qkv[:, :, dk_pad:2 * dk_pad]                        # (tb, n, dk_pad)
    v = qkv[:, :, 2 * dk_pad:]                              # (tb, n, dv_pad)

    # Scores: batched contraction over the last dim — no data transpose.
    # Zero-padded lanes of q/k contribute nothing to the dot product.
    s = jnp.einsum("bqd,bkd->bqk", q, k,
                   preferred_element_type=jnp.float32) * norm_fact   # (tb, n, n)

    # Softmax (f32 math).
    s = s - jnp.max(s, axis=-1, keepdims=True)
    p = jnp.exp(s)
    p = p * pl.reciprocal(jnp.sum(p, axis=-1, keepdims=True), approx=True)

    out = jnp.einsum("bqk,bkd->bqd", p, v,
                     preferred_element_type=jnp.float32)    # (tb, n, dv_pad)
    # dv_pad is a multiple of 128 -> unmasked, lane-dense stores.
    o_ref[...] = out.astype(o_ref.dtype)


def self_attention(x, wq, wk, wv, *, tb=None):
    """x: (batch, n, dim_q); wq/wk: (dim_k, dim_q); wv: (dim_v, dim_q).

    Implements: softmax((x Wq^T)(x Wk^T)^T / sqrt(dim_k)) (x Wv^T).
    """
    batch, n, dim_q = x.shape
    dim_k = wq.shape[0]
    dim_v = wv.shape[0]
    norm_fact = 1.0 / math.sqrt(dim_k)

    # Pad each projection's output width to a multiple of 128 lanes and pack
    # the pre-transposed weights into one fused slab (zero columns elsewhere).
    dk_pad = _round_up(dim_k, 128)
    dv_pad = _round_up(dim_v, 128)
    fused = 2 * dk_pad + dv_pad

    w_all = jnp.zeros((dim_q, fused), dtype=x.dtype)
    w_all = w_all.at[:, 0:dim_k].set(wq.T.astype(x.dtype))
    w_all = w_all.at[:, dk_pad:dk_pad + dim_k].set(wk.T.astype(x.dtype))
    w_all = w_all.at[:, 2 * dk_pad:2 * dk_pad + dim_v].set(wv.T.astype(x.dtype))

    if tb is None:
        tb = _pick_tb(batch)
    assert batch % tb == 0, "tb must divide batch"
    grid = (batch // tb,)

    kernel = functools.partial(
        _self_attention_kernel,
        norm_fact=norm_fact, dk_pad=dk_pad, tb=tb, n=n)

    itemsize = jnp.dtype(x.dtype).itemsize
    cost = pl.CostEstimate(
        flops=2 * batch * (3 * n * dim_q * dim_k + n * n * dim_k + n * n * dim_v),
        transcendentals=batch * n * n,
        bytes_accessed=(x.size + w_all.size + batch * n * dv_pad) * itemsize,
    )

    out_pad = pl.pallas_call(
        kernel,
        out_shape=jax.ShapeDtypeStruct((batch, n, dv_pad), x.dtype),
        grid_spec=pltpu.PrefetchScalarGridSpec(
            num_scalar_prefetch=0,
            grid=grid,
            in_specs=[
                pl.BlockSpec((tb, n, dim_q), lambda b: (b, 0, 0)),
                pl.BlockSpec((dim_q, fused), lambda b: (0, 0)),
            ],
            out_specs=pl.BlockSpec((tb, n, dv_pad), lambda b: (b, 0, 0)),
        ),
        compiler_params=pltpu.CompilerParams(
            dimension_semantics=("parallel",),
        ),
        cost_estimate=cost,
    )(x, w_all)

    # Drop the zero-padded output lanes (cheap wrapper-side slice).
    return out_pad[:, :, :dim_v]


def _reference(x, wq, wk, wv, dim_k):
    q = x @ wq.T
    k = x @ wk.T
    v = x @ wv.T
    dist = jnp.einsum("bnk,bmk->bnm", q, k) / math.sqrt(dim_k)
    dist = jax.nn.softmax(dist, axis=-1)
    return jnp.einsum("bnm,bmv->bnv", dist, v)


if __name__ == "__main__":
    # Small shapes consistent with the module: batch=2, seq n=8, dim_q=32,
    # dim_k=32, dim_v=32.
    batch, n, dim_q, dim_k, dim_v = 2, 8, 32, 32, 32

    key = jax.random.PRNGKey(0)
    kx, kq, kk, kv = jax.random.split(key, 4)

    x = jax.random.normal(kx, (batch, n, dim_q), dtype=jnp.float32)
    # Deterministic "Kaiming-uniform-ish" init matching nn.Linear shapes.
    bound = 1.0 / math.sqrt(dim_q)
    wq = jax.random.uniform(kq, (dim_k, dim_q), jnp.float32, -bound, bound)
    wk = jax.random.uniform(kk, (dim_k, dim_q), jnp.float32, -bound, bound)
    wv = jax.random.uniform(kv, (dim_v, dim_q), jnp.float32, -bound, bound)

    out = self_attention(x, wq, wk, wv)
    out = jax.block_until_ready(out)

    ref = _reference(x, wq, wk, wv, dim_k)
    assert out.shape == (batch, n, dim_v)
    # approx=True reciprocal in the softmax epilogue -> slightly looser tol.
    assert jnp.allclose(out, ref, atol=2e-3, rtol=2e-3), (
        float(jnp.max(jnp.abs(out - ref)))
    )
    print("KERNEL_OK")
</pallas_src>

<mosaic_0001>
module attributes {stable_mosaic.version = 11 : i64} {
  func.func @_self_attention_kernel(%arg0: i32, %arg1: memref<2x8x32xf32, #tpu.memory_space<vmem>>, %arg2: memref<32x384xf32, #tpu.memory_space<vmem>>, %arg3: memref<2x8x128xf32, #tpu.memory_space<vmem>>) attributes {dimension_semantics = [#tpu.dimension_semantics<parallel>], iteration_bounds = array<i64: 1>, scalar_prefetch = 0 : i64, scratch_operands = 0 : i64, tpu.core_type = #tpu.core_type<tc>, window_params = [{transform_indices = @transform_0, window_bounds = array<i64: 2, 8, 32>}, {pipeline_mode = #tpu.pipeline_mode<synchronous>, transform_indices = @transform_1, window_bounds = array<i64: 32, 384>}, {transform_indices = @transform_2, window_bounds = array<i64: 2, 8, 128>}]} {
    %c0 = arith.constant 0 : index
    %c0_0 = arith.constant 0 : index
    %c0_1 = arith.constant 0 : index
    %0 = vector.load %arg1[%c0, %c0_0, %c0_1] : memref<2x8x32xf32, #tpu.memory_space<vmem>>, vector<2x8x32xf32>
    %c0_2 = arith.constant 0 : index
    %c0_3 = arith.constant 0 : index
    %1 = vector.load %arg2[%c0_2, %c0_3] : memref<32x384xf32, #tpu.memory_space<vmem>>, vector<32x384xf32>
    %2 = vector.shape_cast %0 : vector<2x8x32xf32> to vector<16x32xf32>
    %cst = arith.constant dense<0.000000e+00> : vector<16x384xf32>
    %3 = tpu.matmul %2, %1, %cst {dimension_numbers = #tpu.dot_dimension_numbers<[1], [0], [0], [1], [0, 0, 1, 1], [], []>} : vector<16x32xf32>, vector<32x384xf32>, vector<16x384xf32> -> vector<16x384xf32>
    %4 = vector.shape_cast %3 : vector<16x384xf32> to vector<2x8x384xf32>
    %5 = vector.extract_strided_slice %4 {offsets = [0, 0, 0], sizes = [2, 8, 128], strides = [1, 1, 1]} : vector<2x8x384xf32> to vector<2x8x128xf32>
    %6 = vector.extract_strided_slice %4 {offsets = [0, 0, 128], sizes = [2, 8, 128], strides = [1, 1, 1]} : vector<2x8x384xf32> to vector<2x8x128xf32>
    %7 = vector.extract_strided_slice %4 {offsets = [0, 0, 256], sizes = [2, 8, 128], strides = [1, 1, 1]} : vector<2x8x384xf32> to vector<2x8x128xf32>
    "tpu.trace_start"() <{level = 10 : i32, message = "bqd,bkd->bqk"}> : () -> ()
    %cst_4 = arith.constant dense<0.000000e+00> : vector<2x8x8xf32>
    %8 = tpu.matmul %5, %6, %cst_4 {dimension_numbers = #tpu.dot_dimension_numbers<[2], [2], [1], [1], [0, 0, 0, 1, 1, 1], [0], [0]>} : vector<2x8x128xf32>, vector<2x8x128xf32>, vector<2x8x8xf32> -> vector<2x8x8xf32>
    "tpu.trace_stop"() : () -> ()
    %cst_5 = arith.constant 0.176776692 : f32
    %9 = vector.broadcast %cst_5 : f32 to vector<2x8x8xf32>
    %10 = arith.mulf %8, %9 : vector<2x8x8xf32>
    %cst_6 = arith.constant dense<0xFF800000> : vector<2x8xf32>
    %11 = vector.multi_reduction <maximumf>, %10, %cst_6 [2] : vector<2x8x8xf32> to vector<2x8xf32>
    %12 = vector.shape_cast %11 : vector<2x8xf32> to vector<2x8x1xf32>
    %13 = vector.broadcast %12 : vector<2x8x1xf32> to vector<2x8x8xf32>
    %14 = arith.subf %10, %13 : vector<2x8x8xf32>
    %15 = math.exp %14 : vector<2x8x8xf32>
    %cst_7 = arith.constant dense<0.000000e+00> : vector<2x8xf32>
    %16 = vector.multi_reduction <add>, %15, %cst_7 [2] : vector<2x8x8xf32> to vector<2x8xf32>
    %17 = vector.shape_cast %16 : vector<2x8xf32> to vector<2x8x1xf32>
    %18 = tpu.reciprocal %17 {approx = true} : vector<2x8x1xf32> -> vector<2x8x1xf32>
    %19 = vector.broadcast %18 : vector<2x8x1xf32> to vector<2x8x8xf32>
    %20 = arith.mulf %15, %19 : vector<2x8x8xf32>
    "tpu.trace_start"() <{level = 10 : i32, message = "bqk,bkd->bqd"}> : () -> ()
    %cst_8 = arith.constant dense<0.000000e+00> : vector<2x8x128xf32>
    %21 = tpu.matmul %20, %7, %cst_8 {dimension_numbers = #tpu.dot_dimension_numbers<[2], [1], [1], [2], [0, 0, 0, 1, 1, 2], [0], [0]>} : vector<2x8x8xf32>, vector<2x8x128xf32>, vector<2x8x128xf32> -> vector<2x8x128xf32>
    "tpu.trace_stop"() : () -> ()
    %c0_9 = arith.constant 0 : index
    %c0_10 = arith.constant 0 : index
    %c0_11 = arith.constant 0 : index
    %22 = vector.load %arg3[%c0_9, %c0_10, %c0_11] : memref<2x8x128xf32, #tpu.memory_space<vmem>>, vector<2x8x128xf32>
    tpu.vector_store %arg3[%c0_9, %c0_10, %c0_11], %21 {strides = array<i32>} : memref<2x8x128xf32, #tpu.memory_space<vmem>>, vector<2x8x128xf32>,
    return
  }
  func.func @transform_0(%arg0: i32) -> (i32, i32, i32) {
    %c0_i32 = arith.constant 0 : i32
    %c0_i32_0 = arith.constant 0 : i32
    %c0_i32_1 = arith.constant 0 : i32
    return %arg0, %c0_i32, %c0_i32_0 : i32, i32, i32
  }
  func.func @transform_1(%arg0: i32) -> (i32, i32) {
    %c0_i32 = arith.constant 0 : i32
    %c0_i32_0 = arith.constant 0 : i32
    %c0_i32_1 = arith.constant 0 : i32
    return %c0_i32, %c0_i32_0 : i32, i32
  }
  func.func @transform_2(%arg0: i32) -> (i32, i32, i32) {
    %c0_i32 = arith.constant 0 : i32
    %c0_i32_0 = arith.constant 0 : i32
    %c0_i32_1 = arith.constant 0 : i32
    return %arg0, %c0_i32, %c0_i32_0 : i32, i32, i32
  }
}

</mosaic_0001>

<bundles_post_ra>
// kernel: tpu_custom_call.1
= control target key start
LH: loop header
LB: loop body
LE: loop exit
PB: predicated region body
PF: predicated region fallthrough
CT: control target
= control target key end

     0   :  { %7 = vsyncpa [#allocation3], 0  ;;  %s417_s0 = inlined_call_operand.hbm [shape: f32[2,8,32], index: 0, kind: input, shape index: {}]   ;;  %s418_s1 = inlined_call_operand.hbm [shape: f32[32,384], index: 1, kind: input, shape index: {}]   ;;  %s419_s2 = inlined_call_operand.hbm [shape: f32[2,8,128], index: 2, kind: output, shape index: {}]  }
   0x1   :  { %8 = vsyncpa [#allocation6], 0 }
   0x2   :  { %9 = vsyncpa [#allocation4], 0  ;;  %s14_s11 = sshll.u32 %s417_s0, 4  ;;  %s368_s12 = smov [#allocation2]   ;;  %s15_s11 = int_to_ptr.hbm [resolvable:$true] %s14_s11 }
   0x3   :  { %s16_s13 = sshll.u32 %s368_s12, 4  ;;  %s27_s16 = sshll.u32 %s418_s1, 4  ;;  %s17_s13 = int_to_ptr.vmem [resolvable:$true] %s16_s13  ;;  %s28_s16 = int_to_ptr.hbm [resolvable:$true] %s27_s16 }
   0x4   :  { %s369_s17 = smov 128   ;;  %s370_s18 = smov 8  }
   0x5   :  { %22 = dma.hbm_to_vmem [thread:$0]  %s15_s11, 256, %s17_s13, [#allocation3], %s369_s17, %s369_s17, %s370_s18  }
   0x6   :  { %s371_s19 = smov [#allocation5]   ;;  %s372_s21 = smov 384  }
   0x7   :  { %s29_s20 = sshll.u32 %s371_s19, 4  ;;  %s373_s0 = smov 24   ;;  %s30_s20 = int_to_ptr.vmem [resolvable:$true] %s29_s20 }
   0x8   :  { %35 = dma.hbm_to_vmem [thread:$0]  %s28_s16, 1536, %s30_s20, [#allocation6], %s372_s21, %s372_s21, %s373_s0  }
   0x9   :  { %362 = dma.done.wait [#allocation3], 256  }
   0xa   :  { %363 = vsyncadd [#allocation3], 4294967040 }
   0xb   :  { %364 = dma.done.wait [#allocation6], 1536  }
   0xc   :  { %365 = vsyncadd [#allocation6], 4294965760  ;;  %v56_v0 = vld [vmem:[#allocation5 + $0x50] sm:$0xff]  ;;  %v53_v1 = vld [vmem:[#allocation5 + $0x38] sm:$0xff]  ;;  %vm58_vm0 = vcmask 261120   ;;  %vm176_vm1 = vcmask 64512  }
   0xd   :  { %v55_v2 = vld [vmem:[#allocation5 + $0x48] sm:$0xff]  ;;  %100 = vmatpush.msra.mxu1 %v56_v0  ;;  %v52_v3 = vld [vmem:[#allocation5 + $0x30] sm:$0xff]  ;;  %v50_v4 = vld [vmem:[#allocation5 + $0x20] sm:$0xff]  ;;  %s374_s1 = smov [#allocation7]   ;;  %s253_s25 = sshll.u32 %s419_s2, 4  ;;  %s254_s25 = int_to_ptr.hbm [resolvable:$true] %s253_s25 }
   0xe   :  { %77 = vmatpush.msra.mxu0 %v55_v2  ;;  %v49_v5 = vld [vmem:[#allocation5 + $0x18] sm:$0xff]  ;;  %v47_v6 = vld [vmem:[#allocation5 + $0x8] sm:$0xff]  ;;  %v46_v7 = vld [vmem:[#allocation5] sm:$0xff]  ;;  %s251_s22 = sshll.u32 %s374_s1, 4  ;;  %s252_s22 = int_to_ptr.vmem [resolvable:$true] %s251_s22 }
   0xf   :  { %101 = vmatpush.msra.mxu1 %v53_v1  ;;  %v44_v8 = vld [vmem:[#allocation2] sm:$0xff]  ;;  %v45_v9 = vld [vmem:[#allocation2 + $0x8] sm:$0xff]  ;;  %v54_v15 = vld [vmem:[#allocation5 + $0x40] sm:$0xff] }
  0x10   :  { %78 = vmatpush.msra.mxu0 %v52_v3  ;;  %v57_v14 = vld [vmem:[#allocation5 + $0x58] sm:$0xff]  ;;  %v51_v16 = vld [vmem:[#allocation5 + $0x28] sm:$0xff]  ;;  %v48_v17 = vld [vmem:[#allocation5 + $0x10] sm:$0xff] }
  0x11   :  { %102 = vmatpush.msra.mxu1 %v50_v4  ;;  %123 = vmatpush.msra.mxu2 %v57_v14 }
  0x12   :  { %79 = vmatpush.msra.mxu0 %v49_v5 }
  0x13   :  { %103 = vmatpush.msra.mxu1 %v47_v6  ;;  %124 = vmatpush.msra.mxu2 %v54_v15 }
  0x14   :  { %80 = vmatpush.msra.mxu0 %v46_v7  ;;  %269 = vmatmul.msk.f32.vlgmr.msra.gmra.mxu1 %vm58_vm0, %v44_v8 }
  0x15   :  { %267 = vmatmul.msk.f32.vlgmr.msra.gmra.mxu0 %vm58_vm0, %v44_v8  ;;  %125 = vmatpush.msra.mxu2 %v51_v16 }
  0x17   :  { %126 = vmatpush.msra.mxu2 %v48_v17 }
  0x18   :  { %271 = vmatmul.msk.f32.vlgmr.msra.gmra.mxu2 %vm58_vm0, %v44_v8 }
  0x1c   :  { %270 = vmatmul.msk.f32.gmra.mxu1 %vm58_vm0, %v45_v9 }
  0x1d   :  { %268 = vmatmul.msk.f32.gmra.mxu0 %vm58_vm0, %v45_v9 }
  0x20   :  { %272 = vmatmul.msk.f32.gmra.mxu2 %vm58_vm0, %v45_v9 }
  0x91   :  { %v105_v10 = vpop.f32.mrf.mxu1 }
  0x92   :  { %v82_v11 = vpop.f32.mrf.mxu0  ;;  %149 = vmatpush.xpose.msra.mxu3 %v105_v10 }
  0x95   :  { %150 = vmatmul.f32.vlgmr.msra.gmra.mxu3 %v82_v11 }
  0x99   :  { %v108_v12 = vpop.f32.mrf.mxu1 }
  0x9a   :  { %169 = vmatpush.xpose.msrb.mxu3 %v108_v12  ;;  %v85_v13 = vpop.f32.mrf.mxu0 }
  0x9b   :  { %v128_v25 = vpop.f32.mrf.mxu2 }
  0x9d   :  { %170 = vmatmul.f32.vlgmr.msrb.gmra.mxu3 %v85_v13 }
  0x9e   :  { %217 = vmatpush.msra.mxu3 %v128_v25 }
  0xa3   :  { %v131_v35 = vpop.f32.mrf.mxu2 }
  0xa4   :  { %240 = vmatpush.msrb.mxu0 %v131_v35 }
 0x118   :  { %v151_v18 = vpop.f32.mrf.mxu3 }
 0x119   :  { %v174_v19 = vmul.f32 0.17677669, %v151_v18 }
 0x11b   :  { %v177_v20 = vsel %vm176_vm1, %v174_v19, -inf }
 0x11c   :  { %178 = vmax.xlane.f32.xlu0 %v177_v20 }
 0x120   :  { %v171_v21 = vpop.f32.mrf.mxu3 }
 0x121   :  { %v175_v22 = vmul.f32 0.17677669, %v171_v21 }
 0x123   :  { %v180_v23 = vsel %vm176_vm1, %v175_v22, -inf }
 0x124   :  { %181 = vmax.xlane.f32.xlu0 %v180_v23 }
 0x18f   :  { %v179_v24 = vpop.xlane.xlu0 %178 }
 0x190   :  { %v183_v26 = vsub.f32 %v174_v19, %v179_v24 }
 0x192   :  { %v185_v27 = vmul.f32 1.442695, %v183_v26 }
 0x194   :  { %282 = vpow2.f32 %v185_v27 }
 0x197   :  { %v182_v28 = vpop.xlane.xlu0 %181 }
 0x198   :  { %v184_v29 = vsub.f32 %v175_v22, %v182_v28 }
 0x19a   :  { %v283_v30 = vpop.eup %282  ;;  %v187_v31 = vmul.f32 1.442695, %v184_v29 }
 0x19b   :  { %v189_v32 = vsel %vm176_vm1, %v283_v30, 0.0 }
 0x19c   :  { %284 = vpow2.f32 %v187_v31  ;;  %190 = vadd.xlane.f32.xlu1 %v189_v32 }
 0x1a2   :  { %v285_v33 = vpop.eup %284 }
 0x1a3   :  { %v192_v34 = vsel %vm176_vm1, %v285_v33, 0.0 }
 0x1a4   :  { %193 = vadd.xlane.f32.xlu1 %v192_v34 }
 0x20f   :  { %v191_v36 = vpop.xlane.xlu1 %190 }
 0x210   :  { %286 = vrcp.f32 %v191_v36 }
 0x216   :  { %v287_v37 = vpop.eup %286 }
 0x217   :  { %v197_v38 = vmul.f32 %v287_v37, %v283_v30  ;;  %v194_v39 = vpop.xlane.xlu1 %193 }
 0x218   :  { %288 = vrcp.f32 %v194_v39 }
 0x219   :  { %273 = vmatmul.msk.f32.vlgmr.msra.gmra.mxu3 %vm176_vm1, %v197_v38 }
 0x21e   :  { %v289_v40 = vpop.eup %288 }
 0x21f   :  { %v198_v41 = vmul.f32 %v289_v40, %v285_v33 }
 0x221   :  { %274 = vmatmul.msk.f32.vlgmr.msrb.gmra.mxu0 %vm176_vm1, %v198_v41 }
 0x29c   :  { %v219_v42 = vpop.f32.mrf.mxu3 }
 0x29d   :  { %245 = vst [vmem:[#allocation7] sm:$0xff] %v219_v42 }
 0x29e   :  { %v242_v43 = vpop.f32.mrf.mxu0 }
 0x29f   :  { %246 = vst [vmem:[#allocation7 + $0x8] sm:$0xff] %v242_v43 }
 0x2a0   :  { %259 = dma.vmem_to_hbm [thread:$0]  %s252_s22, 256, %s254_s25, [#allocation4], %s369_s17, %s369_s17, %s370_s18  }
 0x2a1   :  { %366 = dma.done.wait [#allocation4], 256  }
 0x2a2   :  { %367 = vsyncadd [#allocation4], 4294967040 }
 0x2a3   :  { %264 = vsyncpa [#allocation3], 1 }
 0x2a4   :  { %265 = vsyncpa [#allocation6], 1 }
 0x2a5   :  { %266 = vsyncpa [#allocation4], 1 }

</bundles_post_ra>
